<compile_context>
chip_gen: v6e
topology: v6e:2x2x1
jax: 0.10.0
libtpu: 0.0.40
codegen_flags: <defaults>
</compile_context>

<pallas_src>
import functools

import jax
import jax.numpy as jnp
from jax.experimental import pallas as pl
from jax.experimental.pallas import tpu as pltpu

LANE = 128
MAX_BLOCK_ROWS = 2048      # 2048 * 128 * 4 B = 1 MiB per f32 input tile
MAX_CORES = 2              # v7x has 2 TensorCores per chip


def _mse_kernel(x_ref, y_ref, o_ref, acc_ref, *, block_rows, blocks_per_core,
                total_rows, needs_mask):
    # x_ref, y_ref: (block_rows, LANE) VMEM tiles (native dtype, cast below)
    # o_ref:        (1, 1) f32 SMEM — this core's partial sum of squared diffs
    # acc_ref:      (block_rows, LANE) f32 VMEM accumulator (per core)
    c = pl.program_id(0)   # parallel (core) axis
    i = pl.program_id(1)   # sequential reduction axis

    @pl.when(i == 0)
    def _():
        acc_ref[...] = jnp.zeros_like(acc_ref)

    d = x_ref[...].astype(jnp.float32) - y_ref[...].astype(jnp.float32)
    sq = d * d

    if needs_mask:
        # Zero out rows past the true end (partial final tile and any phantom
        # tile assigned to the second core when the block count is odd).
        logical_block = c * blocks_per_core + i
        row_ids = logical_block * block_rows + jax.lax.broadcasted_iota(
            jnp.int32, sq.shape, 0)
        sq = jnp.where(row_ids < total_rows, sq, 0.0)

    acc_ref[...] += sq     # elementwise VPU accumulate; no per-step reduce

    @pl.when(i == blocks_per_core - 1)
    def _():
        o_ref[0, 0] = jnp.sum(acc_ref[...])


def mse_loss(x, y):
    assert x.shape == y.shape, "x and y must have identical shapes"
    n = x.size
    if n == 0:
        return jnp.float32(0.0)

    # DMA floating inputs in their native dtype (bf16 halves HBM traffic) and
    # cast to f32 inside the kernel; promote non-float dtypes up front.
    if not jnp.issubdtype(x.dtype, jnp.floating):
        x = x.astype(jnp.float32)
    if not jnp.issubdtype(y.dtype, jnp.floating):
        y = y.astype(jnp.float32)

    xf = jnp.reshape(x, (-1,))
    yf = jnp.reshape(y, (-1,))

    rows = n // LANE
    tail = n - rows * LANE

    # Ragged (< LANE)-element tail handled in plain JAX — avoids jnp.pad, which
    # would copy both inputs in HBM before the kernel even runs.
    tail_ssd = None
    if tail:
        dt = (xf[rows * LANE:].astype(jnp.float32)
              - yf[rows * LANE:].astype(jnp.float32))
        tail_ssd = jnp.sum(dt * dt)

    if rows == 0:
        return tail_ssd / jnp.float32(n)

    if tail:
        xm = xf[: rows * LANE].reshape(rows, LANE)
        ym = yf[: rows * LANE].reshape(rows, LANE)
    else:
        xm = xf.reshape(rows, LANE)
        ym = yf.reshape(rows, LANE)

    # Tile / grid selection.
    block_rows = rows if rows <= MAX_BLOCK_ROWS else MAX_BLOCK_ROWS
    num_blocks = pl.cdiv(rows, block_rows)
    num_cores = MAX_CORES if num_blocks >= MAX_CORES else 1
    blocks_per_core = pl.cdiv(num_blocks, num_cores)
    covered_rows = num_cores * blocks_per_core * block_rows
    needs_mask = covered_rows > rows
    has_phantom = num_cores * blocks_per_core > num_blocks

    if has_phantom:
        # Phantom tiles re-read the last valid tile; their contribution is
        # masked to zero in the kernel via the logical row indices.
        def in_map(c, i):
            return (jnp.minimum(c * blocks_per_core + i, num_blocks - 1), 0)
    else:
        def in_map(c, i):
            return (c * blocks_per_core + i, 0)

    kernel = functools.partial(
        _mse_kernel,
        block_rows=block_rows,
        blocks_per_core=blocks_per_core,
        total_rows=rows,
        needs_mask=needs_mask,
    )

    bytes_accessed = (int(xm.size) * xm.dtype.itemsize
                      + int(ym.size) * ym.dtype.itemsize
                      + 4 * num_cores)

    partial_sums = pl.pallas_call(
        kernel,
        out_shape=jax.ShapeDtypeStruct((num_cores, 1), jnp.float32),
        grid_spec=pltpu.PrefetchScalarGridSpec(
            num_scalar_prefetch=0,
            grid=(num_cores, blocks_per_core),
            in_specs=[
                pl.BlockSpec((block_rows, LANE), in_map),
                pl.BlockSpec((block_rows, LANE), in_map),
            ],
            out_specs=pl.BlockSpec(
                (1, 1), lambda c, i: (c, 0), memory_space=pltpu.SMEM
            ),
            scratch_shapes=[pltpu.VMEM((block_rows, LANE), jnp.float32)],
        ),
        compiler_params=pltpu.CompilerParams(
            dimension_semantics=("parallel", "arbitrary"),
        ),
        cost_estimate=pl.CostEstimate(
            flops=3 * rows * LANE,
            transcendentals=0,
            bytes_accessed=bytes_accessed,
        ),
    )(xm, ym)

    ssd = jnp.sum(partial_sums)
    if tail_ssd is not None:
        ssd = ssd + tail_ssd
    return ssd * jnp.float32(1.0 / n)


if __name__ == "__main__":
    # Spec shape from the PyTorch module's example inputs: NCHW [2, 4, 16, 16].
    kx, ky = jax.random.split(jax.random.PRNGKey(0))
    x = jax.random.normal(kx, (2, 4, 16, 16), dtype=jnp.float32)
    y = jax.random.normal(ky, (2, 4, 16, 16), dtype=jnp.float32)

    loss = mse_loss(x, y)
    jax.block_until_ready(loss)
    ref = jnp.mean((x - y) ** 2)
    assert jnp.allclose(loss, ref, rtol=1e-5, atol=1e-6), (loss, ref)

    # Extra coverage: multi-tile + 2-way core split with a masked partial tile.
    kx2, ky2 = jax.random.split(jax.random.PRNGKey(1))
    x2 = jax.random.normal(kx2, (2, 4, 381, 128), dtype=jnp.float32)
    y2 = jax.random.normal(ky2, (2, 4, 381, 128), dtype=jnp.float32)
    loss2 = mse_loss(x2, y2)
    jax.block_until_ready(loss2)
    ref2 = jnp.mean((x2 - y2) ** 2)
    assert jnp.allclose(loss2, ref2, rtol=1e-5, atol=1e-6), (loss2, ref2)

    # Extra coverage: ragged tail (n % 128 != 0) with bf16 inputs (half the
    # HBM bytes; cast to f32 inside the kernel).
    kx3, ky3 = jax.random.split(jax.random.PRNGKey(2))
    x3 = jax.random.normal(kx3, (2, 4, 18, 100), dtype=jnp.bfloat16)
    y3 = jax.random.normal(ky3, (2, 4, 18, 100), dtype=jnp.bfloat16)
    loss3 = mse_loss(x3, y3)
    jax.block_until_ready(loss3)
    ref3 = jnp.mean((x3.astype(jnp.float32) - y3.astype(jnp.float32)) ** 2)
    assert jnp.allclose(loss3, ref3, rtol=1e-4, atol=1e-5), (loss3, ref3)

    print("KERNEL_OK")
</pallas_src>

<mosaic_0001>
module attributes {stable_mosaic.version = 11 : i64} {
  func.func @_mse_kernel(%arg0: i32, %arg1: i32, %arg2: memref<16x128xf32, #tpu.memory_space<vmem>>, %arg3: memref<16x128xf32, #tpu.memory_space<vmem>>, %arg4: memref<1x1xf32, #tpu.memory_space<smem>>, %arg5: memref<16x128xf32, #tpu.memory_space<vmem>>) attributes {dimension_semantics = [#tpu.dimension_semantics<parallel>, #tpu.dimension_semantics<arbitrary>], iteration_bounds = array<i64: 1, 1>, scalar_prefetch = 0 : i64, scratch_operands = 1 : i64, tpu.core_type = #tpu.core_type<tc>, window_params = [{transform_indices = @transform_0, window_bounds = array<i64: 16, 128>}, {transform_indices = @transform_1, window_bounds = array<i64: 16, 128>}, {transform_indices = @transform_2, window_bounds = array<i64: 1, 1>}]} {
    %c0_i32 = arith.constant 0 : i32
    %0 = arith.cmpi eq, %arg1, %c0_i32 : i32
    %1 = arith.extui %0 : i1 to i32
    %c0_i32_0 = arith.constant 0 : i32
    %2 = arith.cmpi ne, %1, %c0_i32_0 : i32
    scf.if %2 {
      %cst = arith.constant 0.000000e+00 : f32
      %13 = vector.broadcast %cst : f32 to vector<16x128xf32>
      %c0_10 = arith.constant 0 : index
      %c0_11 = arith.constant 0 : index
      %14 = vector.load %arg5[%c0_10, %c0_11] : memref<16x128xf32, #tpu.memory_space<vmem>>, vector<16x128xf32>
      tpu.vector_store %arg5[%c0_10, %c0_11], %13 {strides = array<i32>} : memref<16x128xf32, #tpu.memory_space<vmem>>, vector<16x128xf32>,
    } else {
    }
    %c0 = arith.constant 0 : index
    %c0_1 = arith.constant 0 : index
    %3 = vector.load %arg2[%c0, %c0_1] : memref<16x128xf32, #tpu.memory_space<vmem>>, vector<16x128xf32>
    %c0_2 = arith.constant 0 : index
    %c0_3 = arith.constant 0 : index
    %4 = vector.load %arg3[%c0_2, %c0_3] : memref<16x128xf32, #tpu.memory_space<vmem>>, vector<16x128xf32>
    %5 = arith.subf %3, %4 : vector<16x128xf32>
    %6 = arith.mulf %5, %5 : vector<16x128xf32>
    %c0_4 = arith.constant 0 : index
    %c0_5 = arith.constant 0 : index
    %7 = vector.load %arg5[%c0_4, %c0_5] : memref<16x128xf32, #tpu.memory_space<vmem>>, vector<16x128xf32>
    %8 = arith.addf %7, %6 : vector<16x128xf32>
    %c0_6 = arith.constant 0 : index
    %c0_7 = arith.constant 0 : index
    %9 = vector.load %arg5[%c0_6, %c0_7] : memref<16x128xf32, #tpu.memory_space<vmem>>, vector<16x128xf32>
    tpu.vector_store %arg5[%c0_6, %c0_7], %8 {strides = array<i32>} : memref<16x128xf32, #tpu.memory_space<vmem>>, vector<16x128xf32>,
    %c0_i32_8 = arith.constant 0 : i32
    %10 = arith.cmpi eq, %arg1, %c0_i32_8 : i32
    %11 = arith.extui %10 : i1 to i32
    %c0_i32_9 = arith.constant 0 : i32
    %12 = arith.cmpi ne, %11, %c0_i32_9 : i32
    scf.if %12 {
      %c0_10 = arith.constant 0 : index
      %c0_11 = arith.constant 0 : index
      %13 = vector.load %arg5[%c0_10, %c0_11] : memref<16x128xf32, #tpu.memory_space<vmem>>, vector<16x128xf32>
      %14 = vector.shape_cast %13 : vector<16x128xf32> to vector<1x16x128xf32>
      %cst = arith.constant dense<0.000000e+00> : vector<1xf32>
      %15 = vector.multi_reduction <add>, %14, %cst [1, 2] : vector<1x16x128xf32> to vector<1xf32>
      %16 = vector.shape_cast %15 : vector<1xf32> to vector<1x1x1xf32>
      %17 = vector.extract %16[0, 0, 0] : f32 from vector<1x1x1xf32>
      %c0_12 = arith.constant 0 : index
      %c0_13 = arith.constant 0 : index
      %18 = memref.load %arg4[%c0_12, %c0_13] : memref<1x1xf32, #tpu.memory_space<smem>>
      memref.store %17, %arg4[%c0_12, %c0_13] : memref<1x1xf32, #tpu.memory_space<smem>>
    } else {
    }
    return
  }
  func.func @transform_0(%arg0: i32, %arg1: i32) -> (i32, i32) {
    %c1_i32 = arith.constant 1 : i32
    %0 = arith.muli %arg0, %c1_i32 : i32
    %1 = arith.addi %0, %arg1 : i32
    %c0_i32 = arith.constant 0 : i32
    %c0_i32_0 = arith.constant 0 : i32
    return %1, %c0_i32 : i32, i32
  }
  func.func @transform_1(%arg0: i32, %arg1: i32) -> (i32, i32) {
    %c1_i32 = arith.constant 1 : i32
    %0 = arith.muli %arg0, %c1_i32 : i32
    %1 = arith.addi %0, %arg1 : i32
    %c0_i32 = arith.constant 0 : i32
    %c0_i32_0 = arith.constant 0 : i32
    return %1, %c0_i32 : i32, i32
  }
  func.func @transform_2(%arg0: i32, %arg1: i32) -> (i32, i32) {
    %c0_i32 = arith.constant 0 : i32
    %c0_i32_0 = arith.constant 0 : i32
    return %arg0, %c0_i32 : i32, i32
  }
}

</mosaic_0001>

<bundles_post_ra>
// kernel: tpu_custom_call.1
= control target key start
LH: loop header
LB: loop body
LE: loop exit
PB: predicated region body
PF: predicated region fallthrough
CT: control target
= control target key end

     0   :  { %7 = vsyncpa [#allocation4], 0  ;;  %s194_s0 = inlined_call_operand.hbm [shape: f32[16,128], index: 0, kind: input, shape index: {}]   ;;  %s195_s1 = inlined_call_operand.hbm [shape: f32[16,128], index: 1, kind: input, shape index: {}]   ;;  %s196_s2 = inlined_call_operand.hbm [shape: f32[1,1], index: 2, kind: output, shape index: {}]  }
   0x1   :  { %8 = vsyncpa [#allocation7], 0 }
   0x2   :  { %9 = vsyncpa [#allocation5], 0  ;;  %s165_s9 = smov [#allocation3]  }
   0x3   :  { %s19_s10 = sshll.u32 %s165_s9, 4  ;;  %s20_s10 = int_to_ptr.vmem [resolvable:$true] %s19_s10 }
   0x4   :  { %s119_s11 = scalar_lea.vmem %s20_s10, 256  ;;  %p124_p1 = scmp.lt.s32.totalorder %s20_s10, %s20_s10 }
   0x5   :  { %p120_p0 = scmp.ne.s32.totalorder %s20_s10, %s119_s11  ;;  %p125_p2 = scmp.lt.s32.totalorder %s119_s11, %s119_s11 }
   0x7   :  { %p126_p3 = por %p125_p2, %p124_p1 }
   0x9   :  { %p127_p4 = pnand %p126_p3, %p120_p0 }
   0xb   :  { %130 = shalt.err (!%p127_p4)
}
   0xc   :  { %s166_s12 = smov 128   ;;  %s167_s13 = smov 8  }
   0xd   :  { %25 = dma.hbm_to_vmem [thread:$0]  %s194_s0, 256, %s20_s10, [#allocation4], %s166_s12, %s166_s12, %s167_s13  }
   0xe   :  { %s168_s16 = smov [#allocation6]  }
   0xf   :  { %s35_s17 = sshll.u32 %s168_s16, 4  ;;  %s36_s17 = int_to_ptr.vmem [resolvable:$true] %s35_s17 }
  0x10   :  { %s139_s18 = scalar_lea.vmem %s36_s17, 256  ;;  %p144_p6 = scmp.lt.s32.totalorder %s36_s17, %s36_s17 }
  0x11   :  { %p140_p5 = scmp.ne.s32.totalorder %s36_s17, %s139_s18  ;;  %p145_p7 = scmp.lt.s32.totalorder %s139_s18, %s139_s18 }
  0x13   :  { %p146_p8 = por %p145_p7, %p144_p6 }
  0x15   :  { %p147_p9 = pnand %p146_p8, %p140_p5 }
  0x17   :  { %150 = shalt.err (!%p147_p9)
}
  0x18   :  { %41 = dma.hbm_to_vmem [thread:$0]  %s195_s1, 256, %s36_s17, [#allocation7], %s166_s12, %s166_s12, %s167_s13  }
  0x19   :  { %159 = dma.done.wait [#allocation4], 256  }
  0x1a   :  { %160 = vsyncadd [#allocation4], 4294967040 }
  0x1b   :  { %161 = dma.done.wait [#allocation7], 256  }
  0x1c   :  { %162 = vsyncadd [#allocation7], 4294967040  ;;  %v58_v0 = vld [vmem:[#allocation3] sm:$0xff]  ;;  %v59_v1 = vld [vmem:[#allocation3 + $0x8] sm:$0xff]  ;;  %s169_s1 = smov [#allocation8]  }
  0x1d   :  { %v60_v2 = vld [vmem:[#allocation6] sm:$0xff]  ;;  %v61_v3 = vld [vmem:[#allocation6 + $0x8] sm:$0xff] }
  0x1e   :  { %v62_v4 = vsub.f32 %v58_v0, %v60_v2  ;;  %v63_v5 = vsub.f32 %v59_v1, %v61_v3 }
  0x20   :  { %v64_v6 = vmul.f32 %v62_v4, %v62_v4  ;;  %v65_v7 = vmul.f32 %v63_v5, %v63_v5 }
  0x22   :  { %v77_v8 = vadd.f32 %v65_v7, %v64_v6 }
  0x24   :  { %78 = vadd.xlane.f32.xlu0 %v77_v8 }
  0xad   :  { %v79_v9 = vpop.xlane.xlu0 %78 }
  0xae   :  { %v80_v10 = vrot.slane %v79_v9, 4 }
  0xb0   :  { %v81_v11 = vadd.f32 %v80_v10, %v79_v9 }
  0xb2   :  { %v82_v12 = vrot.slane %v81_v11, 2 }
  0xb4   :  { %v83_v13 = vadd.f32 %v82_v12, %v81_v11 }
  0xb6   :  { %v84_v14 = vrot.slane %v83_v13, 1 }
  0xb8   :  { %v85_v15 = vadd.f32 %v84_v14, %v83_v13 }
  0xba   :  { %104 = vpush %v85_v15 }
  0xeb   :  { %s105_s0 = spop %104 }
  0xec   :  { %88 = sst [smem:[#allocation8]] %s105_s0 }
  0xed   :  { %96 = dma.smem_to_hbm %s169_s1, 16, %s196_s2, [#allocation5]  }
  0xee   :  { %163 = dma.done.wait [#allocation5], 16  }
  0xef   :  { %164 = vsyncadd [#allocation5], 4294967280 }
  0xf0   :  { %100 = sfence }
  0xf1   :  { %101 = vsyncpa [#allocation4], 1 }
  0xf2   :  { %102 = vsyncpa [#allocation7], 1 }
  0xf3   :  { %103 = vsyncpa [#allocation5], 1 }

</bundles_post_ra>
